<compile_context>
chip_gen: v5e
topology: v5e:2x2
jax: 0.10.0
libtpu: 0.0.40
codegen_flags: <defaults>
</compile_context>

<pallas_src>
import functools

import jax
import jax.numpy as jnp
from jax.experimental import pallas as pl
from jax.experimental.pallas import tpu as pltpu


# ----------------------------- helpers ------------------------------------


def _round_up(x, m):
    return ((x + m - 1) // m) * m


def _pad2(a, rows, cols):
    return jnp.pad(a, ((0, rows - a.shape[0]), (0, cols - a.shape[1])))


def _pick_tile(dim, preferred):
    """Largest multiple of 128 that divides `dim` and is <= preferred.

    Assumes dim % 128 == 0 (all padded dims are)."""
    t = min(preferred, dim)
    t -= t % 128
    t = max(t, 128)
    while dim % t != 0:
        t -= 128
    return t


def _pick_row_tile(n_p, preferred):
    """Row tile; keep >=2 row steps when possible so both v7x TCs get work."""
    tm = _pick_tile(n_p, preferred)
    if n_p // tm < 2 and n_p >= 256:
        tm = _pick_tile(n_p, max(n_p // 2, 128))
    return tm


# ------------------------- Pallas kernels ----------------------------------


def xw_kernel(x_ref, w_ref, o_ref):
    # Feature transform (layer 0): (TM, Cin) @ (Cin, Cout) on the MXU.
    # Inputs are already bf16 (cast once in the wrapper), f32 accumulation.
    o_ref[...] = jnp.dot(
        x_ref[...], w_ref[...], preferred_element_type=jnp.float32
    ).astype(o_ref.dtype)


def feature_transform(x, w, out_dtype=jnp.bfloat16):
    """XW = X @ W. x: (N_p, Cin_p) bf16, w: (Cin_p, Cout_p) bf16."""
    n_p, cin_p = x.shape
    cout_p = w.shape[1]
    tm = _pick_row_tile(n_p, 512)
    return pl.pallas_call(
        xw_kernel,
        out_shape=jax.ShapeDtypeStruct((n_p, cout_p), out_dtype),
        grid_spec=pltpu.PrefetchScalarGridSpec(
            num_scalar_prefetch=0,
            grid=(n_p // tm,),
            in_specs=[
                pl.BlockSpec((tm, cin_p), lambda i: (i, 0)),
                pl.BlockSpec((cin_p, cout_p), lambda i: (0, 0)),  # resident
            ],
            out_specs=pl.BlockSpec((tm, cout_p), lambda i: (i, 0)),
        ),
        compiler_params=pltpu.CompilerParams(dimension_semantics=("parallel",)),
    )(x, w)


def _make_agg_kernel(tk, xw_resident, fuse_next):
    """Aggregation kernel: acc += A_tile @ XW_tile, epilogue = bias+ReLU
    (and, when fuse_next, the NEXT layer's feature transform)."""

    def kernel(*refs):
        if fuse_next:
            a_ref, xw_ref, b_ref, wn_ref, o_ref, acc_ref = refs
        else:
            a_ref, xw_ref, b_ref, o_ref, acc_ref = refs

        k = pl.program_id(1)

        @pl.when(k == 0)
        def _():
            acc_ref[...] = jnp.zeros_like(acc_ref)

        if xw_resident:
            # XW is fully resident in VMEM; slice the k-th reduction panel.
            off = pl.multiple_of(k * tk, tk)
            xw_tile = xw_ref[pl.ds(off, tk), :]
        else:
            xw_tile = xw_ref[...]

        # A_hat tile (TM, TK) @ XW panel (TK, Cout) -> MXU, f32 accumulation.
        acc_ref[...] += jnp.dot(
            a_ref[...], xw_tile, preferred_element_type=jnp.float32
        )

        @pl.when(k == pl.num_programs(1) - 1)
        def _():
            # bias + ReLU epilogue on the VPU.
            z = jnp.maximum(acc_ref[...] + b_ref[...], 0.0)
            if fuse_next:
                # Fused next-layer feature transform: (TM, Cout) @ (Cout, Cnext)
                # on the otherwise-idle MXU during the epilogue step.
                o_ref[...] = jnp.dot(
                    z.astype(jnp.bfloat16),
                    wn_ref[...],
                    preferred_element_type=jnp.float32,
                ).astype(o_ref.dtype)
            else:
                o_ref[...] = z.astype(o_ref.dtype)

    return kernel


def aggregate(a_hat, xw, b, w_next=None, out_dtype=jnp.bfloat16):
    """ReLU(A_hat @ XW + b) [optionally @ W_next].

    a_hat: (N_p, N_p) bf16, xw: (N_p, Cout_p) bf16, b: (1, Cout_p) f32,
    w_next: optional (Cout_p, Cnext_p) bf16."""
    n_p = a_hat.shape[0]
    cout_p = xw.shape[1]
    fuse_next = w_next is not None
    cout_next_p = w_next.shape[1] if fuse_next else cout_p
    out_cols = cout_next_p if fuse_next else cout_p

    tm = _pick_row_tile(n_p, 512)
    # Cap tk when the output width is very wide to keep the streamed XW panel
    # and accumulator comfortably inside default scoped VMEM (v5e: 16 MiB).
    tk = _pick_tile(n_p, 512 if cout_p > 512 else 1024)

    # Keep the whole XW (N_p x Cout_p) resident in VMEM when small enough
    # (<= 4 MiB; double-buffered worst case 8 MiB) so it is DMA'd exactly once.
    xw_resident = n_p * cout_p * xw.dtype.itemsize <= (4 << 20)

    grid = (n_p // tm, n_p // tk)

    if xw_resident:
        xw_spec = pl.BlockSpec((n_p, cout_p), lambda i, k: (0, 0))
    else:
        # Streamed fallback for very large N*Cout (re-read factor n_p // tm).
        xw_spec = pl.BlockSpec((tk, cout_p), lambda i, k: (k, 0))

    in_specs = [
        pl.BlockSpec((tm, tk), lambda i, k: (i, k)),     # A_hat (streamed once)
        xw_spec,                                          # XW
        pl.BlockSpec((1, cout_p), lambda i, k: (0, 0)),   # bias (resident)
    ]
    operands = [a_hat, xw, b]
    if fuse_next:
        in_specs.append(pl.BlockSpec((cout_p, cout_next_p), lambda i, k: (0, 0)))
        operands.append(w_next)

    flops = 2 * n_p * n_p * cout_p + (
        2 * n_p * cout_p * cout_next_p if fuse_next else 0
    )
    bytes_accessed = (
        a_hat.size * a_hat.dtype.itemsize
        + xw.size * xw.dtype.itemsize * (1 if xw_resident else n_p // tm)
        + b.size * b.dtype.itemsize
        + (w_next.size * w_next.dtype.itemsize if fuse_next else 0)
        + n_p * out_cols * jnp.dtype(out_dtype).itemsize
    )

    return pl.pallas_call(
        _make_agg_kernel(tk, xw_resident, fuse_next),
        out_shape=jax.ShapeDtypeStruct((n_p, out_cols), out_dtype),
        grid_spec=pltpu.PrefetchScalarGridSpec(
            num_scalar_prefetch=0,
            grid=grid,
            in_specs=in_specs,
            out_specs=pl.BlockSpec((tm, out_cols), lambda i, k: (i, 0)),
            scratch_shapes=[pltpu.VMEM((tm, cout_p), jnp.float32)],
        ),
        compiler_params=pltpu.CompilerParams(
            dimension_semantics=("parallel", "arbitrary"),
        ),
        cost_estimate=pl.CostEstimate(
            flops=flops, transcendentals=0, bytes_accessed=bytes_accessed
        ),
    )(*operands)


# ------------------------- plain-JAX glue -----------------------------------


def build_normalized_adjacency(edge_index, edge_weight, num_nodes, padded_nodes,
                               out_dtype=jnp.bfloat16):
    """Dense A_hat = D^{-1/2}(A + I)D^{-1/2} (PyG gcn_norm), built directly
    into a (padded_nodes, padded_nodes) matrix and cast once to out_dtype.

    Mirrors add_remaining_self_loops: existing self-loops are collapsed to a
    single per-node loop keeping their weight, missing ones are added with 1.
    A_hat[target, source] = deg_inv_sqrt[src] * w * deg_inv_sqrt[tgt].
    """
    row, col = edge_index[0], edge_index[1]
    if edge_weight is None:
        edge_weight = jnp.ones(row.shape, dtype=jnp.float32)
    edge_weight = edge_weight.astype(jnp.float32)

    is_loop = row == col
    w_edges = jnp.where(is_loop, 0.0, edge_weight)

    loop_idx = jnp.arange(num_nodes, dtype=row.dtype)
    loop_w = jnp.ones((num_nodes,), jnp.float32)
    loop_w = loop_w.at[jnp.where(is_loop, row, num_nodes)].set(
        jnp.where(is_loop, edge_weight, 1.0), mode="drop"
    )

    rows = jnp.concatenate([row, loop_idx])
    cols = jnp.concatenate([col, loop_idx])
    ws = jnp.concatenate([w_edges, loop_w])

    # degree accumulated at the target index (PyG: scatter on col)
    deg = jnp.zeros((num_nodes,), jnp.float32).at[cols].add(ws)
    deg_inv_sqrt = jnp.where(deg > 0, jax.lax.rsqrt(deg), 0.0)
    norm = deg_inv_sqrt[rows] * ws * deg_inv_sqrt[cols]

    # out[col] += norm * x[row]  ==>  A_hat[col, row] = norm
    a_hat = (
        jnp.zeros((padded_nodes, padded_nodes), jnp.float32)
        .at[cols, rows]
        .add(norm)
    )
    return a_hat.astype(out_dtype)


def glorot(key, shape):
    fan_in, fan_out = shape
    limit = jnp.sqrt(6.0 / (fan_in + fan_out))
    return jax.random.uniform(key, shape, jnp.float32, -limit, limit)


class GConvPallas:
    """num_layers GCNConv layers, each followed by ReLU activation."""

    def __init__(self, key, input_dim, hidden_dim, num_layers):
        self.input_dim = input_dim
        self.hidden_dim = hidden_dim
        dims = [input_dim] + [hidden_dim] * num_layers
        self.params = []        # padded bf16/f32 for kernels
        self.params_ref = []    # unpadded f32 for the plain-JAX reference
        for i in range(num_layers):
            key, wk = jax.random.split(key)
            w = glorot(wk, (dims[i], dims[i + 1]))
            b = jnp.zeros((1, dims[i + 1]), jnp.float32)  # PyG bias init = zeros
            self.params_ref.append((w, b))
            cin_p = _round_up(dims[i], 128)
            cout_p = _round_up(dims[i + 1], 128)
            # zero-pad feature dims to 128-lane multiples, bf16 weights for the
            # MXU, f32 bias for the epilogue.
            w_p = _pad2(w, cin_p, cout_p).astype(jnp.bfloat16)
            b_p = _pad2(b, 1, cout_p)
            self.params.append((w_p, b_p))

    @functools.partial(jax.jit, static_argnums=0)
    def _forward(self, x, edge_index, edge_weight):
        n, cin = x.shape
        n_p = _round_up(n, 128)
        cin_p = _round_up(cin, 128)

        # Dense O(N^2) A_hat built (padded, bf16) in plain JAX glue — one pass.
        a_hat = build_normalized_adjacency(edge_index, edge_weight, n, n_p)

        # Pad + cast the input features to bf16 once.
        z0 = (
            jnp.zeros((n_p, cin_p), jnp.bfloat16)
            .at[:n, :cin]
            .set(x.astype(jnp.bfloat16))
        )

        # Layer 0 feature transform; all later ones are fused into the
        # previous layer's aggregation epilogue.
        xw = feature_transform(z0, self.params[0][0])

        num_layers = len(self.params)
        for li in range(num_layers):
            _, b = self.params[li]
            last = li == num_layers - 1
            w_next = None if last else self.params[li + 1][0]
            xw = aggregate(
                a_hat,
                xw,
                b,
                w_next=w_next,
                out_dtype=jnp.float32 if last else jnp.bfloat16,
            )
        return xw[:n, : self.hidden_dim]

    def __call__(self, x, edge_index, edge_weight=None):
        return self._forward(x, edge_index, edge_weight)


def reference_forward(x, edge_index, params_ref, edge_weight=None):
    """Plain-JAX f32 reference: Z = ReLU(A_hat @ (Z @ W) + b) per layer."""
    n = x.shape[0]
    a_hat = build_normalized_adjacency(edge_index, edge_weight, n, n, jnp.float32)
    z = x
    for w, b in params_ref:
        z = jnp.maximum(a_hat @ (z @ w) + b, 0.0)
    return z


if __name__ == "__main__":
    key = jax.random.PRNGKey(0)

    num_nodes = 16
    input_dim = 8
    hidden_dim = 32
    num_layers = 2
    num_edges = 40

    k_x, k_e, k_p = jax.random.split(key, 3)
    x = jax.random.normal(k_x, (num_nodes, input_dim), jnp.float32)
    edge_index = jax.random.randint(k_e, (2, num_edges), 0, num_nodes, jnp.int32)

    model = GConvPallas(k_p, input_dim, hidden_dim, num_layers)
    out = model(x, edge_index)  # (num_nodes, hidden_dim)
    out = jax.block_until_ready(out)

    assert out.shape == (num_nodes, hidden_dim)
    assert bool(jnp.all(jnp.isfinite(out)))
    assert bool(jnp.all(out >= 0.0))  # ReLU output

    # Tolerance check against the f32 plain-JAX reference (kernel uses bf16
    # inputs with f32 accumulation).
    ref = reference_forward(x, edge_index, model.params_ref)
    err = float(jnp.max(jnp.abs(out - ref)))
    assert err < 1e-1, f"max abs error vs f32 reference = {err}"

    print("KERNEL_OK")
</pallas_src>

<mosaic_0001>
module attributes {stable_mosaic.version = 11 : i64} {
  func.func @kernel(%arg0: i32, %arg1: i32, %arg2: memref<128x128xbf16, #tpu.memory_space<vmem>>, %arg3: memref<128x128xbf16, #tpu.memory_space<vmem>>, %arg4: memref<1x128xf32, #tpu.memory_space<vmem>>, %arg5: memref<128x128xbf16, #tpu.memory_space<vmem>>, %arg6: memref<128x128xbf16, #tpu.memory_space<vmem>>, %arg7: memref<128x128xf32, #tpu.memory_space<vmem>>) attributes {dimension_semantics = [#tpu.dimension_semantics<parallel>, #tpu.dimension_semantics<arbitrary>], iteration_bounds = array<i64: 1, 1>, scalar_prefetch = 0 : i64, scratch_operands = 1 : i64, tpu.core_type = #tpu.core_type<tc>, window_params = [{transform_indices = @transform_0, window_bounds = array<i64: 128, 128>}, {pipeline_mode = #tpu.pipeline_mode<synchronous>, transform_indices = @transform_1, window_bounds = array<i64: 128, 128>}, {pipeline_mode = #tpu.pipeline_mode<synchronous>, transform_indices = @transform_2, window_bounds = array<i64: 1, 128>}, {pipeline_mode = #tpu.pipeline_mode<synchronous>, transform_indices = @transform_3, window_bounds = array<i64: 128, 128>}, {transform_indices = @transform_4, window_bounds = array<i64: 128, 128>}]} {
    %c0_i32 = arith.constant 0 : i32
    %0 = arith.cmpi eq, %arg1, %c0_i32 : i32
    %1 = arith.extui %0 : i1 to i32
    %c0_i32_0 = arith.constant 0 : i32
    %2 = arith.cmpi ne, %1, %c0_i32_0 : i32
    scf.if %2 {
      %cst_9 = arith.constant 0.000000e+00 : f32
      %15 = vector.broadcast %cst_9 : f32 to vector<128x128xf32>
      %c0_10 = arith.constant 0 : index
      %c0_11 = arith.constant 0 : index
      %16 = vector.load %arg7[%c0_10, %c0_11] : memref<128x128xf32, #tpu.memory_space<vmem>>, vector<128x128xf32>
      tpu.vector_store %arg7[%c0_10, %c0_11], %15 {strides = array<i32>} : memref<128x128xf32, #tpu.memory_space<vmem>>, vector<128x128xf32>,
    } else {
    }
    %c128_i32 = arith.constant 128 : i32
    %3 = arith.muli %arg1, %c128_i32 : i32
    %4 = tpu.assume_multiple %3, 128 : i32
    %5 = arith.index_cast %4 : i32 to index
    %c0 = arith.constant 0 : index
    %6 = vector.load %arg3[%5, %c0] : memref<128x128xbf16, #tpu.memory_space<vmem>>, vector<128x128xbf16>
    %c0_1 = arith.constant 0 : index
    %c0_2 = arith.constant 0 : index
    %7 = vector.load %arg7[%c0_1, %c0_2] : memref<128x128xf32, #tpu.memory_space<vmem>>, vector<128x128xf32>
    %c0_3 = arith.constant 0 : index
    %c0_4 = arith.constant 0 : index
    %8 = vector.load %arg2[%c0_3, %c0_4] : memref<128x128xbf16, #tpu.memory_space<vmem>>, vector<128x128xbf16>
    %cst = arith.constant dense<0.000000e+00> : vector<128x128xf32>
    %9 = tpu.matmul %8, %6, %cst {dimension_numbers = #tpu.dot_dimension_numbers<[1], [0], [0], [1], [0, 0, 1, 1], [], []>} : vector<128x128xbf16>, vector<128x128xbf16>, vector<128x128xf32> -> vector<128x128xf32>
    %10 = arith.addf %7, %9 : vector<128x128xf32>
    %c0_5 = arith.constant 0 : index
    %c0_6 = arith.constant 0 : index
    %11 = vector.load %arg7[%c0_5, %c0_6] : memref<128x128xf32, #tpu.memory_space<vmem>>, vector<128x128xf32>
    tpu.vector_store %arg7[%c0_5, %c0_6], %10 {strides = array<i32>} : memref<128x128xf32, #tpu.memory_space<vmem>>, vector<128x128xf32>,
    %c0_i32_7 = arith.constant 0 : i32
    %12 = arith.cmpi eq, %arg1, %c0_i32_7 : i32
    %13 = arith.extui %12 : i1 to i32
    %c0_i32_8 = arith.constant 0 : i32
    %14 = arith.cmpi ne, %13, %c0_i32_8 : i32
    scf.if %14 {
      %c0_9 = arith.constant 0 : index
      %c0_10 = arith.constant 0 : index
      %15 = vector.load %arg7[%c0_9, %c0_10] : memref<128x128xf32, #tpu.memory_space<vmem>>, vector<128x128xf32>
      %c0_11 = arith.constant 0 : index
      %c0_12 = arith.constant 0 : index
      %16 = vector.load %arg4[%c0_11, %c0_12] : memref<1x128xf32, #tpu.memory_space<vmem>>, vector<1x128xf32>
      %17 = vector.broadcast %16 : vector<1x128xf32> to vector<128x128xf32>
      %18 = arith.addf %15, %17 : vector<128x128xf32>
      %cst_13 = arith.constant 0.000000e+00 : f32
      %19 = vector.broadcast %cst_13 : f32 to vector<128x128xf32>
      %20 = arith.maximumf %18, %19 : vector<128x128xf32>
      %21 = arith.truncf %20 : vector<128x128xf32> to vector<128x128xbf16>
      %c0_14 = arith.constant 0 : index
      %c0_15 = arith.constant 0 : index
      %22 = vector.load %arg5[%c0_14, %c0_15] : memref<128x128xbf16, #tpu.memory_space<vmem>>, vector<128x128xbf16>
      %cst_16 = arith.constant dense<0.000000e+00> : vector<128x128xf32>
      %23 = tpu.matmul %21, %22, %cst_16 {dimension_numbers = #tpu.dot_dimension_numbers<[1], [0], [0], [1], [0, 0, 1, 1], [], []>} : vector<128x128xbf16>, vector<128x128xbf16>, vector<128x128xf32> -> vector<128x128xf32>
      %24 = arith.truncf %23 : vector<128x128xf32> to vector<128x128xbf16>
      %c0_17 = arith.constant 0 : index
      %c0_18 = arith.constant 0 : index
      %25 = vector.load %arg6[%c0_17, %c0_18] : memref<128x128xbf16, #tpu.memory_space<vmem>>, vector<128x128xbf16>
      tpu.vector_store %arg6[%c0_17, %c0_18], %24 {strides = array<i32>} : memref<128x128xbf16, #tpu.memory_space<vmem>>, vector<128x128xbf16>,
    } else {
    }
    return
  }
  func.func @transform_0(%arg0: i32, %arg1: i32) -> (i32, i32) {
    %c0_i32 = arith.constant 0 : i32
    return %arg0, %arg1 : i32, i32
  }
  func.func @transform_1(%arg0: i32, %arg1: i32) -> (i32, i32) {
    %c0_i32 = arith.constant 0 : i32
    %c0_i32_0 = arith.constant 0 : i32
    %c0_i32_1 = arith.constant 0 : i32
    return %c0_i32, %c0_i32_0 : i32, i32
  }
  func.func @transform_2(%arg0: i32, %arg1: i32) -> (i32, i32) {
    %c0_i32 = arith.constant 0 : i32
    %c0_i32_0 = arith.constant 0 : i32
    %c0_i32_1 = arith.constant 0 : i32
    return %c0_i32, %c0_i32_0 : i32, i32
  }
  func.func @transform_3(%arg0: i32, %arg1: i32) -> (i32, i32) {
    %c0_i32 = arith.constant 0 : i32
    %c0_i32_0 = arith.constant 0 : i32
    %c0_i32_1 = arith.constant 0 : i32
    return %c0_i32, %c0_i32_0 : i32, i32
  }
  func.func @transform_4(%arg0: i32, %arg1: i32) -> (i32, i32) {
    %c0_i32 = arith.constant 0 : i32
    %c0_i32_0 = arith.constant 0 : i32
    return %arg0, %c0_i32 : i32, i32
  }
}

module attributes {stable_mosaic.version = 11 : i64} {
  func.func @xw_kernel(%arg0: i32, %arg1: memref<128x128xbf16, #tpu.memory_space<vmem>>, %arg2: memref<128x128xbf16, #tpu.memory_space<vmem>>, %arg3: memref<128x128xbf16, #tpu.memory_space<vmem>>) attributes {dimension_semantics = [#tpu.dimension_semantics<parallel>], iteration_bounds = array<i64: 1>, scalar_prefetch = 0 : i64, scratch_operands = 0 : i64, tpu.core_type = #tpu.core_type<tc>, window_params = [{transform_indices = @transform_0, window_bounds = array<i64: 128, 128>}, {pipeline_mode = #tpu.pipeline_mode<synchronous>, transform_indices = @transform_1, window_bounds = array<i64: 128, 128>}, {transform_indices = @transform_2, window_bounds = array<i64: 128, 128>}]} {
    %c0 = arith.constant 0 : index
    %c0_0 = arith.constant 0 : index
    %0 = vector.load %arg1[%c0, %c0_0] : memref<128x128xbf16, #tpu.memory_space<vmem>>, vector<128x128xbf16>
    %c0_1 = arith.constant 0 : index
    %c0_2 = arith.constant 0 : index
    %1 = vector.load %arg2[%c0_1, %c0_2] : memref<128x128xbf16, #tpu.memory_space<vmem>>, vector<128x128xbf16>
    %cst = arith.constant dense<0.000000e+00> : vector<128x128xf32>
    %2 = tpu.matmul %0, %1, %cst {dimension_numbers = #tpu.dot_dimension_numbers<[1], [0], [0], [1], [0, 0, 1, 1], [], []>} : vector<128x128xbf16>, vector<128x128xbf16>, vector<128x128xf32> -> vector<128x128xf32>
    %3 = arith.truncf %2 : vector<128x128xf32> to vector<128x128xbf16>
    %c0_3 = arith.constant 0 : index
    %c0_4 = arith.constant 0 : index
    %4 = vector.load %arg3[%c0_3, %c0_4] : memref<128x128xbf16, #tpu.memory_space<vmem>>, vector<128x128xbf16>
    tpu.vector_store %arg3[%c0_3, %c0_4], %3 {strides = array<i32>} : memref<128x128xbf16, #tpu.memory_space<vmem>>, vector<128x128xbf16>,
    return
  }
  func.func @transform_0(%arg0: i32) -> (i32, i32) {
    %c0_i32 = arith.constant 0 : i32
    %c0_i32_0 = arith.constant 0 : i32
    return %arg0, %c0_i32 : i32, i32
  }
  func.func @transform_1(%arg0: i32) -> (i32, i32) {
    %c0_i32 = arith.constant 0 : i32
    %c0_i32_0 = arith.constant 0 : i32
    %c0_i32_1 = arith.constant 0 : i32
    return %c0_i32, %c0_i32_0 : i32, i32
  }
  func.func @transform_2(%arg0: i32) -> (i32, i32) {
    %c0_i32 = arith.constant 0 : i32
    %c0_i32_0 = arith.constant 0 : i32
    return %arg0, %c0_i32 : i32, i32
  }
}

module attributes {stable_mosaic.version = 11 : i64} {
  func.func @kernel(%arg0: i32, %arg1: i32, %arg2: memref<128x128xbf16, #tpu.memory_space<vmem>>, %arg3: memref<128x128xbf16, #tpu.memory_space<vmem>>, %arg4: memref<1x128xf32, #tpu.memory_space<vmem>>, %arg5: memref<128x128xf32, #tpu.memory_space<vmem>>, %arg6: memref<128x128xf32, #tpu.memory_space<vmem>>) attributes {dimension_semantics = [#tpu.dimension_semantics<parallel>, #tpu.dimension_semantics<arbitrary>], iteration_bounds = array<i64: 1, 1>, scalar_prefetch = 0 : i64, scratch_operands = 1 : i64, tpu.core_type = #tpu.core_type<tc>, window_params = [{transform_indices = @transform_0, window_bounds = array<i64: 128, 128>}, {pipeline_mode = #tpu.pipeline_mode<synchronous>, transform_indices = @transform_1, window_bounds = array<i64: 128, 128>}, {pipeline_mode = #tpu.pipeline_mode<synchronous>, transform_indices = @transform_2, window_bounds = array<i64: 1, 128>}, {transform_indices = @transform_3, window_bounds = array<i64: 128, 128>}]} {
    %c0_i32 = arith.constant 0 : i32
    %0 = arith.cmpi eq, %arg1, %c0_i32 : i32
    %1 = arith.extui %0 : i1 to i32
    %c0_i32_0 = arith.constant 0 : i32
    %2 = arith.cmpi ne, %1, %c0_i32_0 : i32
    scf.if %2 {
      %cst_9 = arith.constant 0.000000e+00 : f32
      %15 = vector.broadcast %cst_9 : f32 to vector<128x128xf32>
      %c0_10 = arith.constant 0 : index
      %c0_11 = arith.constant 0 : index
      %16 = vector.load %arg6[%c0_10, %c0_11] : memref<128x128xf32, #tpu.memory_space<vmem>>, vector<128x128xf32>
      tpu.vector_store %arg6[%c0_10, %c0_11], %15 {strides = array<i32>} : memref<128x128xf32, #tpu.memory_space<vmem>>, vector<128x128xf32>,
    } else {
    }
    %c128_i32 = arith.constant 128 : i32
    %3 = arith.muli %arg1, %c128_i32 : i32
    %4 = tpu.assume_multiple %3, 128 : i32
    %5 = arith.index_cast %4 : i32 to index
    %c0 = arith.constant 0 : index
    %6 = vector.load %arg3[%5, %c0] : memref<128x128xbf16, #tpu.memory_space<vmem>>, vector<128x128xbf16>
    %c0_1 = arith.constant 0 : index
    %c0_2 = arith.constant 0 : index
    %7 = vector.load %arg6[%c0_1, %c0_2] : memref<128x128xf32, #tpu.memory_space<vmem>>, vector<128x128xf32>
    %c0_3 = arith.constant 0 : index
    %c0_4 = arith.constant 0 : index
    %8 = vector.load %arg2[%c0_3, %c0_4] : memref<128x128xbf16, #tpu.memory_space<vmem>>, vector<128x128xbf16>
    %cst = arith.constant dense<0.000000e+00> : vector<128x128xf32>
    %9 = tpu.matmul %8, %6, %cst {dimension_numbers = #tpu.dot_dimension_numbers<[1], [0], [0], [1], [0, 0, 1, 1], [], []>} : vector<128x128xbf16>, vector<128x128xbf16>, vector<128x128xf32> -> vector<128x128xf32>
    %10 = arith.addf %7, %9 : vector<128x128xf32>
    %c0_5 = arith.constant 0 : index
    %c0_6 = arith.constant 0 : index
    %11 = vector.load %arg6[%c0_5, %c0_6] : memref<128x128xf32, #tpu.memory_space<vmem>>, vector<128x128xf32>
    tpu.vector_store %arg6[%c0_5, %c0_6], %10 {strides = array<i32>} : memref<128x128xf32, #tpu.memory_space<vmem>>, vector<128x128xf32>,
    %c0_i32_7 = arith.constant 0 : i32
    %12 = arith.cmpi eq, %arg1, %c0_i32_7 : i32
    %13 = arith.extui %12 : i1 to i32
    %c0_i32_8 = arith.constant 0 : i32
    %14 = arith.cmpi ne, %13, %c0_i32_8 : i32
    scf.if %14 {
      %c0_9 = arith.constant 0 : index
      %c0_10 = arith.constant 0 : index
      %15 = vector.load %arg6[%c0_9, %c0_10] : memref<128x128xf32, #tpu.memory_space<vmem>>, vector<128x128xf32>
      %c0_11 = arith.constant 0 : index
      %c0_12 = arith.constant 0 : index
      %16 = vector.load %arg4[%c0_11, %c0_12] : memref<1x128xf32, #tpu.memory_space<vmem>>, vector<1x128xf32>
      %17 = vector.broadcast %16 : vector<1x128xf32> to vector<128x128xf32>
      %18 = arith.addf %15, %17 : vector<128x128xf32>
      %cst_13 = arith.constant 0.000000e+00 : f32
      %19 = vector.broadcast %cst_13 : f32 to vector<128x128xf32>
      %20 = arith.maximumf %18, %19 : vector<128x128xf32>
      %c0_14 = arith.constant 0 : index
      %c0_15 = arith.constant 0 : index
      %21 = vector.load %arg5[%c0_14, %c0_15] : memref<128x128xf32, #tpu.memory_space<vmem>>, vector<128x128xf32>
      tpu.vector_store %arg5[%c0_14, %c0_15], %20 {strides = array<i32>} : memref<128x128xf32, #tpu.memory_space<vmem>>, vector<128x128xf32>,
    } else {
    }
    return
  }
  func.func @transform_0(%arg0: i32, %arg1: i32) -> (i32, i32) {
    %c0_i32 = arith.constant 0 : i32
    return %arg0, %arg1 : i32, i32
  }
  func.func @transform_1(%arg0: i32, %arg1: i32) -> (i32, i32) {
    %c0_i32 = arith.constant 0 : i32
    %c0_i32_0 = arith.constant 0 : i32
    %c0_i32_1 = arith.constant 0 : i32
    return %c0_i32, %c0_i32_0 : i32, i32
  }
  func.func @transform_2(%arg0: i32, %arg1: i32) -> (i32, i32) {
    %c0_i32 = arith.constant 0 : i32
    %c0_i32_0 = arith.constant 0 : i32
    %c0_i32_1 = arith.constant 0 : i32
    return %c0_i32, %c0_i32_0 : i32, i32
  }
  func.func @transform_3(%arg0: i32, %arg1: i32) -> (i32, i32) {
    %c0_i32 = arith.constant 0 : i32
    %c0_i32_0 = arith.constant 0 : i32
    return %arg0, %c0_i32 : i32, i32
  }
}

</mosaic_0001>

<bundles_post_ra>
// kernel: _forward.3
= control target key start
LH: loop header
LB: loop body
LE: loop exit
PB: predicated region body
PF: predicated region fallthrough
CT: control target
= control target key end

     0   :  { %s462_s1 = inlined_call_operand.vmem [shape: bf16[128,128], index: 1, kind: input, shape index: {}]   ;;  %s463_s0 = inlined_call_operand.vmem [shape: bf16[128,128], index: 0, kind: input, shape index: {}]   ;;  %s464_s2 = inlined_call_operand.vmem [shape: bf16[128,128], index: 2, kind: output, shape index: {}]  }
   0x1   :  { %v303_v0 = vld [vmem:[%s462_s1 + $0x38] sm:$0xff]  ;;  %v302_v1 = vld [vmem:[%s462_s1 + $0x30] sm:$0xff]  ;;  %v301_v2 = vld [vmem:[%s462_s1 + $0x28] sm:$0xff] }
   0x2   :  { %139 = vmatpush.bf16.msra.mxu0 %v303_v0  ;;  %351 = vmatpush.bf16.msra.mxu1 %v303_v0  ;;  %v300_v3 = vld [vmem:[%s462_s1 + $0x20] sm:$0xff]  ;;  %v299_v4 = vld [vmem:[%s462_s1 + $0x18] sm:$0xff]  ;;  %v298_v5 = vld [vmem:[%s462_s1 + $0x10] sm:$0xff] }
   0x3   :  { %352 = vmatpush.bf16.msra.mxu2 %v303_v0  ;;  %353 = vmatpush.bf16.msra.mxu3 %v303_v0  ;;  %v297_v6 = vld [vmem:[%s462_s1 + $0x8] sm:$0xff]  ;;  %v296_v7 = vld [vmem:[%s462_s1] sm:$0xff]  ;;  %v290_v9 = vld [vmem:[%s463_s0 + $0x10] sm:$0xff] }
   0x4   :  { %v288_v8 = vld [vmem:[%s463_s0] sm:$0xff]  ;;  %v294_v11 = vld [vmem:[%s463_s0 + $0x30] sm:$0xff]  ;;  %v289_v12 = vld [vmem:[%s463_s0 + $0x8] sm:$0xff] }
   0x5   :  { %v292_v10 = vld [vmem:[%s463_s0 + $0x20] sm:$0xff]  ;;  %v291_v13 = vld [vmem:[%s463_s0 + $0x18] sm:$0xff]  ;;  %v293_v14 = vld [vmem:[%s463_s0 + $0x28] sm:$0xff] }
   0x6   :  { %140 = vmatpush.bf16.msra.mxu0 %v302_v1  ;;  %354 = vmatpush.bf16.msra.mxu1 %v302_v1  ;;  %v295_v15 = vld [vmem:[%s463_s0 + $0x38] sm:$0xff] }
   0x7   :  { %355 = vmatpush.bf16.msra.mxu2 %v302_v1  ;;  %356 = vmatpush.bf16.msra.mxu3 %v302_v1 }
   0xa   :  { %141 = vmatpush.bf16.msra.mxu0 %v301_v2  ;;  %357 = vmatpush.bf16.msra.mxu1 %v301_v2 }
   0xb   :  { %358 = vmatpush.bf16.msra.mxu2 %v301_v2  ;;  %359 = vmatpush.bf16.msra.mxu3 %v301_v2 }
   0xe   :  { %142 = vmatpush.bf16.msra.mxu0 %v300_v3  ;;  %360 = vmatpush.bf16.msra.mxu1 %v300_v3 }
   0xf   :  { %361 = vmatpush.bf16.msra.mxu2 %v300_v3  ;;  %362 = vmatpush.bf16.msra.mxu3 %v300_v3 }
  0x12   :  { %143 = vmatpush.bf16.msra.mxu0 %v299_v4  ;;  %363 = vmatpush.bf16.msra.mxu1 %v299_v4 }
  0x13   :  { %364 = vmatpush.bf16.msra.mxu2 %v299_v4  ;;  %365 = vmatpush.bf16.msra.mxu3 %v299_v4 }
  0x16   :  { %144 = vmatpush.bf16.msra.mxu0 %v298_v5  ;;  %366 = vmatpush.bf16.msra.mxu1 %v298_v5 }
  0x17   :  { %367 = vmatpush.bf16.msra.mxu2 %v298_v5  ;;  %368 = vmatpush.bf16.msra.mxu3 %v298_v5 }
  0x1a   :  { %145 = vmatpush.bf16.msra.mxu0 %v297_v6  ;;  %369 = vmatpush.bf16.msra.mxu1 %v297_v6 }
  0x1b   :  { %370 = vmatpush.bf16.msra.mxu2 %v297_v6  ;;  %371 = vmatpush.bf16.msra.mxu3 %v297_v6 }
  0x1e   :  { %146 = vmatpush.bf16.msra.mxu0 %v296_v7  ;;  %372 = vmatpush.bf16.msra.mxu1 %v296_v7 }
  0x1f   :  { %373 = vmatpush.bf16.msra.mxu2 %v296_v7  ;;  %374 = vmatpush.bf16.msra.mxu3 %v296_v7 }
  0x21   :  { %147 = vmatmul.bf16.vlgmr.msra.gmra.mxu0 %v288_v8  ;;  %157 = vmatmul.bf16.vlgmr.msra.gmra.mxu1 %v290_v9 }
  0x22   :  { %167 = vmatmul.bf16.vlgmr.msra.gmra.mxu2 %v292_v10  ;;  %177 = vmatmul.bf16.vlgmr.msra.gmra.mxu3 %v294_v11 }
  0x31   :  { %152 = vmatmul.bf16.gmra.mxu0 %v289_v12  ;;  %162 = vmatmul.bf16.gmra.mxu1 %v291_v13 }
  0x32   :  { %172 = vmatmul.bf16.gmra.mxu2 %v293_v14  ;;  %182 = vmatmul.bf16.gmra.mxu3 %v295_v15 }
  0x9e   :  { %v148_v16 = vpop.f32.mrf.mxu0  ;;  %v158_v17 = vpop.f32.mrf.mxu1 }
  0xa5   :  { %v168_v18 = vpop.f32.mrf.mxu2  ;;  %v178_v19 = vpop.f32.mrf.mxu3 }
  0xa6   :  { %v150_v20 = vpop.f32.mrf.mxu0  ;;  %v160_v21 = vpop.f32.mrf.mxu1 }
  0xa7   :  { %v307_v22 = vpack.c.bf16 %v150_v20, %v148_v16  ;;  %v317_v23 = vpack.c.bf16 %v160_v21, %v158_v17 }
  0xa9   :  { %308 = vst [vmem:[%s464_s2] sm:$0xff] %v307_v22  }
  0xaa   :  { %345 = vst [vmem:[%s464_s2 + $0x10] sm:$0xff] %v317_v23  }
  0xad   :  { %v170_v24 = vpop.f32.mrf.mxu2  ;;  %v180_v25 = vpop.f32.mrf.mxu3 }
  0xae   :  { %v327_v26 = vpack.c.bf16 %v170_v24, %v168_v18  ;;  %v337_v27 = vpack.c.bf16 %v180_v25, %v178_v19  ;;  %v153_v28 = vpop.f32.mrf.mxu0  ;;  %v163_v29 = vpop.f32.mrf.mxu1 }
  0xb0   :  { %347 = vst [vmem:[%s464_s2 + $0x20] sm:$0xff] %v327_v26  }
  0xb1   :  { %349 = vst [vmem:[%s464_s2 + $0x30] sm:$0xff] %v337_v27  }
  0xb5   :  { %v173_v30 = vpop.f32.mrf.mxu2  ;;  %v183_v31 = vpop.f32.mrf.mxu3 }
  0xb6   :  { %v155_v32 = vpop.f32.mrf.mxu0  ;;  %v165_v33 = vpop.f32.mrf.mxu1 }
  0xb7   :  { %v312_v34 = vpack.c.bf16 %v155_v32, %v153_v28  ;;  %v322_v35 = vpack.c.bf16 %v165_v33, %v163_v29 }
  0xb9   :  { %344 = vst [vmem:[%s464_s2 + $0x8] sm:$0xff] %v312_v34  }
  0xba   :  { %346 = vst [vmem:[%s464_s2 + $0x18] sm:$0xff] %v322_v35  }
  0xbd   :  { %v175_v36 = vpop.f32.mrf.mxu2  ;;  %v185_v37 = vpop.f32.mrf.mxu3 }
  0xbe   :  { %v332_v38 = vpack.c.bf16 %v175_v36, %v173_v30  ;;  %v342_v39 = vpack.c.bf16 %v185_v37, %v183_v31 }
  0xc0   :  { %348 = vst [vmem:[%s464_s2 + $0x28] sm:$0xff] %v332_v38  }
  0xc1   :  { %350 = vst [vmem:[%s464_s2 + $0x38] sm:$0xff] %v342_v39  }

// kernel: _forward.4
= control target key start
LH: loop header
LB: loop body
LE: loop exit
PB: predicated region body
PF: predicated region fallthrough
CT: control target
= control target key end

     0   :  { %s789_s1 = inlined_call_operand.vmem [shape: bf16[128,128], index: 1, kind: input, shape index: {}]   ;;  %s790_s2 = inlined_call_operand.vmem [shape: f32[1,128], index: 2, kind: input, shape index: {}]   ;;  %s791_s0 = inlined_call_operand.vmem [shape: bf16[128,128], index: 0, kind: input, shape index: {}]   ;;  %s792_s3 = inlined_call_operand.vmem [shape: bf16[128,128], index: 3, kind: input, shape index: {}]   ;;  %s793_s4 = inlined_call_operand.vmem [shape: bf16[128,128], index: 4, kind: output, shape index: {}]  }
   0x1   :  { %v584_v0 = vld [vmem:[%s789_s1 + $0x38] sm:$0xff]  ;;  %v583_v1 = vld [vmem:[%s789_s1 + $0x30] sm:$0xff]  ;;  %v582_v2 = vld [vmem:[%s789_s1 + $0x28] sm:$0xff] }
   0x2   :  { %186 = vmatpush.bf16.msra.mxu0 %v584_v0  ;;  %648 = vmatpush.bf16.msra.mxu2 %v584_v0  ;;  %v581_v3 = vld [vmem:[%s789_s1 + $0x20] sm:$0xff]  ;;  %v580_v4 = vld [vmem:[%s789_s1 + $0x18] sm:$0xff]  ;;  %v579_v5 = vld [vmem:[%s789_s1 + $0x10] sm:$0xff] }
   0x3   :  { %v578_v6 = vld [vmem:[%s789_s1 + $0x8] sm:$0xff]  ;;  %v577_v7 = vld [vmem:[%s789_s1] sm:$0xff]  ;;  %v600_v12 = vld [vmem:[%s792_s3 + $0x38] sm:$0xff] }
   0x4   :  { %v585_v8 = vld [vmem:[%s791_s0] sm:$0xff]  ;;  %v586_v10 = vld [vmem:[%s791_s0 + $0x8] sm:$0xff]  ;;  %394 = vmatpush.bf16.msra.mxu1 %v600_v12  ;;  %v599_v13 = vld [vmem:[%s792_s3 + $0x30] sm:$0xff]  ;;  %656 = vmatpush.bf16.msra.mxu3 %v600_v12 }
   0x5   :  { %v589_v9 = vld [vmem:[%s791_s0 + $0x20] sm:$0xff]  ;;  %v590_v11 = vld [vmem:[%s791_s0 + $0x28] sm:$0xff]  ;;  %v587_v16 = vld [vmem:[%s791_s0 + $0x10] sm:$0xff] }
   0x6   :  { %187 = vmatpush.bf16.msra.mxu0 %v583_v1  ;;  %649 = vmatpush.bf16.msra.mxu2 %v583_v1  ;;  %v598_v14 = vld [vmem:[%s792_s3 + $0x28] sm:$0xff]  ;;  %v597_v15 = vld [vmem:[%s792_s3 + $0x20] sm:$0xff]  ;;  %v591_v17 = vld [vmem:[%s791_s0 + $0x30] sm:$0xff] }
   0x7   :  { %v588_v18 = vld [vmem:[%s791_s0 + $0x18] sm:$0xff]  ;;  %v595_v21 = vld [vmem:[%s792_s3 + $0x10] sm:$0xff]  ;;  %v594_v22 = vld [vmem:[%s792_s3 + $0x8] sm:$0xff] }
   0x8   :  { %395 = vmatpush.bf16.msra.mxu1 %v599_v13  ;;  %657 = vmatpush.bf16.msra.mxu3 %v599_v13  ;;  %v592_v19 = vld [vmem:[%s791_s0 + $0x38] sm:$0xff]  ;;  %v593_v23 = vld [vmem:[%s792_s3] sm:$0xff] }
   0x9   :  { %v596_v20 = vld [vmem:[%s792_s3 + $0x18] sm:$0xff]  ;;  %v664_v25 = vld [vmem:[%s790_s2] ss:$0 sm:$0xff] }
   0xa   :  { %188 = vmatpush.bf16.msra.mxu0 %v582_v2  ;;  %650 = vmatpush.bf16.msra.mxu2 %v582_v2 }
   0xc   :  { %396 = vmatpush.bf16.msra.mxu1 %v598_v14  ;;  %658 = vmatpush.bf16.msra.mxu3 %v598_v14 }
   0xe   :  { %189 = vmatpush.bf16.msra.mxu0 %v581_v3  ;;  %651 = vmatpush.bf16.msra.mxu2 %v581_v3 }
  0x10   :  { %397 = vmatpush.bf16.msra.mxu1 %v597_v15  ;;  %659 = vmatpush.bf16.msra.mxu3 %v597_v15 }
  0x12   :  { %190 = vmatpush.bf16.msra.mxu0 %v580_v4  ;;  %652 = vmatpush.bf16.msra.mxu2 %v580_v4 }
  0x14   :  { %398 = vmatpush.bf16.msra.mxu1 %v596_v20  ;;  %660 = vmatpush.bf16.msra.mxu3 %v596_v20 }
  0x16   :  { %191 = vmatpush.bf16.msra.mxu0 %v579_v5  ;;  %653 = vmatpush.bf16.msra.mxu2 %v579_v5 }
  0x18   :  { %399 = vmatpush.bf16.msra.mxu1 %v595_v21  ;;  %661 = vmatpush.bf16.msra.mxu3 %v595_v21 }
  0x1a   :  { %192 = vmatpush.bf16.msra.mxu0 %v578_v6  ;;  %654 = vmatpush.bf16.msra.mxu2 %v578_v6 }
  0x1c   :  { %400 = vmatpush.bf16.msra.mxu1 %v594_v22  ;;  %662 = vmatpush.bf16.msra.mxu3 %v594_v22 }
  0x1e   :  { %193 = vmatpush.bf16.msra.mxu0 %v577_v7  ;;  %655 = vmatpush.bf16.msra.mxu2 %v577_v7 }
  0x20   :  { %401 = vmatpush.bf16.msra.mxu1 %v593_v23  ;;  %663 = vmatpush.bf16.msra.mxu3 %v593_v23 }
  0x21   :  { %194 = vmatmul.bf16.vlgmr.msra.gmra.mxu0 %v585_v8  ;;  %214 = vmatmul.bf16.vlgmr.msra.gmra.mxu2 %v589_v9 }
  0x31   :  { %199 = vmatmul.bf16.gmra.mxu0 %v586_v10  ;;  %219 = vmatmul.bf16.gmra.mxu2 %v590_v11 }
  0x41   :  { %204 = vmatmul.bf16.gmra.mxu0 %v587_v16  ;;  %224 = vmatmul.bf16.gmra.mxu2 %v591_v17 }
  0x51   :  { %209 = vmatmul.bf16.gmra.mxu0 %v588_v18  ;;  %229 = vmatmul.bf16.gmra.mxu2 %v592_v19 }
  0x9e   :  { %v195_v24 = vpop.f32.mrf.mxu0 }
  0x9f   :  { %v290_v26 = vadd.f32 %v664_v25, %v195_v24 }
  0xa1   :  { %v306_v29 = vmax.f32 %v290_v26, 0.0 }
  0xa4   :  { %v215_v27 = vpop.f32.mrf.mxu2 }
  0xa5   :  { %v298_v32 = vadd.f32 %v664_v25, %v215_v27 }
  0xa6   :  { %v197_v28 = vpop.f32.mrf.mxu0 }
  0xa7   :  { %v291_v30 = vadd.f32 %v664_v25, %v197_v28  ;;  %v314_v37 = vmax.f32 %v298_v32, 0.0 }
  0xa9   :  { %v307_v31 = vmax.f32 %v291_v30, 0.0 }
  0xab   :  { %v322_v33 = vpack.c.bf16 %v307_v31, %v306_v29 }
  0xac   :  { %v217_v34 = vpop.f32.mrf.mxu2 }
  0xad   :  { %v299_v35 = vadd.f32 %v664_v25, %v217_v34  ;;  %402 = vmatmul.bf16.vlgmr.msra.gmra.mxu1 %v322_v33 }
  0xae   :  { %v200_v36 = vpop.f32.mrf.mxu0 }
  0xaf   :  { %v315_v38 = vmax.f32 %v299_v35, 0.0  ;;  %v292_v40 = vadd.f32 %v664_v25, %v200_v36 }
  0xb1   :  { %v326_v39 = vpack.c.bf16 %v315_v38, %v314_v37  ;;  %v308_v43 = vmax.f32 %v292_v40, 0.0 }
  0xb3   :  { %422 = vmatmul.bf16.vlgmr.msra.gmra.mxu3 %v326_v39 }
  0xb4   :  { %v220_v41 = vpop.f32.mrf.mxu2 }
  0xb5   :  { %v300_v46 = vadd.f32 %v664_v25, %v220_v41 }
  0xb6   :  { %v202_v42 = vpop.f32.mrf.mxu0 }
  0xb7   :  { %v293_v44 = vadd.f32 %v664_v25, %v202_v42  ;;  %v316_v51 = vmax.f32 %v300_v46, 0.0 }
  0xb9   :  { %v309_v45 = vmax.f32 %v293_v44, 0.0 }
  0xbb   :  { %v323_v47 = vpack.c.bf16 %v309_v45, %v308_v43 }
  0xbc   :  { %v222_v48 = vpop.f32.mrf.mxu2 }
  0xbd   :  { %v301_v49 = vadd.f32 %v664_v25, %v222_v48  ;;  %407 = vmatmul.bf16.gmra.mxu1 %v323_v47 }
  0xbe   :  { %v205_v50 = vpop.f32.mrf.mxu0 }
  0xbf   :  { %v317_v52 = vmax.f32 %v301_v49, 0.0  ;;  %v294_v54 = vadd.f32 %v664_v25, %v205_v50 }
  0xc1   :  { %v327_v53 = vpack.c.bf16 %v317_v52, %v316_v51  ;;  %v310_v57 = vmax.f32 %v294_v54, 0.0 }
  0xc3   :  { %427 = vmatmul.bf16.gmra.mxu3 %v327_v53 }
  0xc4   :  { %v225_v55 = vpop.f32.mrf.mxu2 }
  0xc5   :  { %v302_v60 = vadd.f32 %v664_v25, %v225_v55 }
  0xc6   :  { %v207_v56 = vpop.f32.mrf.mxu0 }
  0xc7   :  { %v295_v58 = vadd.f32 %v664_v25, %v207_v56  ;;  %v318_v1 = vmax.f32 %v302_v60, 0.0 }
  0xc9   :  { %v311_v59 = vmax.f32 %v295_v58, 0.0 }
  0xcb   :  { %v324_v61 = vpack.c.bf16 %v311_v59, %v310_v57 }
  0xcc   :  { %v227_v62 = vpop.f32.mrf.mxu2 }
  0xcd   :  { %v303_v63 = vadd.f32 %v664_v25, %v227_v62  ;;  %412 = vmatmul.bf16.gmra.mxu1 %v324_v61 }
  0xce   :  { %v210_v0 = vpop.f32.mrf.mxu0 }
  0xcf   :  { %v319_v2 = vmax.f32 %v303_v63, 0.0  ;;  %v296_v4 = vadd.f32 %v664_v25, %v210_v0 }
  0xd1   :  { %v328_v3 = vpack.c.bf16 %v319_v2, %v318_v1  ;;  %v312_v7 = vmax.f32 %v296_v4, 0.0 }
  0xd3   :  { %432 = vmatmul.bf16.gmra.mxu3 %v328_v3 }
  0xd4   :  { %v230_v5 = vpop.f32.mrf.mxu2 }
  0xd5   :  { %v304_v10 = vadd.f32 %v664_v25, %v230_v5 }
  0xd6   :  { %v212_v6 = vpop.f32.mrf.mxu0 }
  0xd7   :  { %v297_v8 = vadd.f32 %v664_v25, %v212_v6  ;;  %v320_v14 = vmax.f32 %v304_v10, 0.0 }
  0xd9   :  { %v313_v9 = vmax.f32 %v297_v8, 0.0 }
  0xdb   :  { %v325_v11 = vpack.c.bf16 %v313_v9, %v312_v7 }
  0xdc   :  { %v232_v12 = vpop.f32.mrf.mxu2 }
  0xdd   :  { %v305_v13 = vadd.f32 %v664_v25, %v232_v12  ;;  %417 = vmatmul.bf16.gmra.mxu1 %v325_v11 }
  0xdf   :  { %v321_v15 = vmax.f32 %v305_v13, 0.0 }
  0xe1   :  { %v329_v16 = vpack.c.bf16 %v321_v15, %v320_v14 }
  0xe3   :  { %437 = vmatmul.bf16.gmra.mxu3 %v329_v16 }
 0x12a   :  { %v403_v17 = vpop.f32.mrf.mxu1 }
 0x132   :  { %v405_v18 = vpop.f32.mrf.mxu1 }
 0x133   :  { %v604_v19 = vpack.c.bf16 %v405_v18, %v403_v17 }
 0x135   :  { %605 = vst [vmem:[%s793_s4] sm:$0xff] %v604_v19  }
 0x136   :  { %v423_v20 = vpop.f32.mrf.mxu3 }
 0x13a   :  { %v408_v21 = vpop.f32.mrf.mxu1 }
 0x13e   :  { %v425_v22 = vpop.f32.mrf.mxu3 }
 0x13f   :  { %v624_v23 = vpack.c.bf16 %v425_v22, %v423_v20 }
 0x141   :  { %644 = vst [vmem:[%s793_s4 + $0x20] sm:$0xff] %v624_v23  }
 0x142   :  { %v410_v24 = vpop.f32.mrf.mxu1 }
 0x143   :  { %v609_v25 = vpack.c.bf16 %v410_v24, %v408_v21 }
 0x145   :  { %641 = vst [vmem:[%s793_s4 + $0x8] sm:$0xff] %v609_v25  }
 0x146   :  { %v428_v26 = vpop.f32.mrf.mxu3 }
 0x14a   :  { %v413_v27 = vpop.f32.mrf.mxu1 }
 0x14e   :  { %v430_v28 = vpop.f32.mrf.mxu3 }
 0x14f   :  { %v629_v29 = vpack.c.bf16 %v430_v28, %v428_v26 }
 0x151   :  { %645 = vst [vmem:[%s793_s4 + $0x28] sm:$0xff] %v629_v29  }
 0x152   :  { %v415_v30 = vpop.f32.mrf.mxu1 }
 0x153   :  { %v614_v31 = vpack.c.bf16 %v415_v30, %v413_v27 }
 0x155   :  { %642 = vst [vmem:[%s793_s4 + $0x10] sm:$0xff] %v614_v31  }
 0x156   :  { %v433_v32 = vpop.f32.mrf.mxu3 }
 0x15a   :  { %v418_v33 = vpop.f32.mrf.mxu1 }
 0x15e   :  { %v435_v34 = vpop.f32.mrf.mxu3 }
 0x15f   :  { %v634_v35 = vpack.c.bf16 %v435_v34, %v433_v32 }
 0x161   :  { %646 = vst [vmem:[%s793_s4 + $0x30] sm:$0xff] %v634_v35  }
 0x162   :  { %v420_v36 = vpop.f32.mrf.mxu1 }
 0x163   :  { %v619_v37 = vpack.c.bf16 %v420_v36, %v418_v33 }
 0x165   :  { %643 = vst [vmem:[%s793_s4 + $0x18] sm:$0xff] %v619_v37  }
 0x166   :  { %v438_v38 = vpop.f32.mrf.mxu3 }
 0x16e   :  { %v440_v39 = vpop.f32.mrf.mxu3 }
 0x16f   :  { %v639_v40 = vpack.c.bf16 %v440_v39, %v438_v38 }
 0x171   :  { %647 = vst [vmem:[%s793_s4 + $0x38] sm:$0xff] %v639_v40  }

// kernel: _forward.5
= control target key start
LH: loop header
LB: loop body
LE: loop exit
PB: predicated region body
PF: predicated region fallthrough
CT: control target
= control target key end

     0   :  { %s565_s1 = inlined_call_operand.vmem [shape: bf16[128,128], index: 1, kind: input, shape index: {}]   ;;  %s566_s2 = inlined_call_operand.vmem [shape: f32[1,128], index: 2, kind: input, shape index: {}]   ;;  %s567_s0 = inlined_call_operand.vmem [shape: bf16[128,128], index: 0, kind: input, shape index: {}]   ;;  %s568_s3 = inlined_call_operand.vmem [shape: f32[128,128], index: 3, kind: output, shape index: {}]  }
   0x1   :  { %v412_v0 = vld [vmem:[%s565_s1 + $0x38] sm:$0xff]  ;;  %v411_v1 = vld [vmem:[%s565_s1 + $0x30] sm:$0xff]  ;;  %v410_v2 = vld [vmem:[%s565_s1 + $0x28] sm:$0xff] }
   0x2   :  { %183 = vmatpush.bf16.msra.mxu0 %v412_v0  ;;  %421 = vmatpush.bf16.msra.mxu1 %v412_v0  ;;  %v409_v3 = vld [vmem:[%s565_s1 + $0x20] sm:$0xff]  ;;  %v408_v4 = vld [vmem:[%s565_s1 + $0x18] sm:$0xff]  ;;  %v407_v5 = vld [vmem:[%s565_s1 + $0x10] sm:$0xff] }
   0x3   :  { %422 = vmatpush.bf16.msra.mxu2 %v412_v0  ;;  %423 = vmatpush.bf16.msra.mxu3 %v412_v0  ;;  %v406_v6 = vld [vmem:[%s565_s1 + $0x8] sm:$0xff]  ;;  %v405_v7 = vld [vmem:[%s565_s1] sm:$0xff]  ;;  %v415_v9 = vld [vmem:[%s567_s0 + $0x10] sm:$0xff] }
   0x4   :  { %v413_v8 = vld [vmem:[%s567_s0] sm:$0xff]  ;;  %v419_v11 = vld [vmem:[%s567_s0 + $0x30] sm:$0xff]  ;;  %v414_v12 = vld [vmem:[%s567_s0 + $0x8] sm:$0xff] }
   0x5   :  { %v417_v10 = vld [vmem:[%s567_s0 + $0x20] sm:$0xff]  ;;  %v416_v13 = vld [vmem:[%s567_s0 + $0x18] sm:$0xff]  ;;  %v418_v14 = vld [vmem:[%s567_s0 + $0x28] sm:$0xff] }
   0x6   :  { %184 = vmatpush.bf16.msra.mxu0 %v411_v1  ;;  %424 = vmatpush.bf16.msra.mxu1 %v411_v1  ;;  %v420_v15 = vld [vmem:[%s567_s0 + $0x38] sm:$0xff]  ;;  %v445_v16 = vld [vmem:[%s566_s2] ss:$0 sm:$0xff] }
   0x7   :  { %425 = vmatpush.bf16.msra.mxu2 %v411_v1  ;;  %426 = vmatpush.bf16.msra.mxu3 %v411_v1 }
   0xa   :  { %185 = vmatpush.bf16.msra.mxu0 %v410_v2  ;;  %427 = vmatpush.bf16.msra.mxu1 %v410_v2 }
   0xb   :  { %428 = vmatpush.bf16.msra.mxu2 %v410_v2  ;;  %429 = vmatpush.bf16.msra.mxu3 %v410_v2 }
   0xe   :  { %186 = vmatpush.bf16.msra.mxu0 %v409_v3  ;;  %430 = vmatpush.bf16.msra.mxu1 %v409_v3 }
   0xf   :  { %431 = vmatpush.bf16.msra.mxu2 %v409_v3  ;;  %432 = vmatpush.bf16.msra.mxu3 %v409_v3 }
  0x12   :  { %187 = vmatpush.bf16.msra.mxu0 %v408_v4  ;;  %433 = vmatpush.bf16.msra.mxu1 %v408_v4 }
  0x13   :  { %434 = vmatpush.bf16.msra.mxu2 %v408_v4  ;;  %435 = vmatpush.bf16.msra.mxu3 %v408_v4 }
  0x16   :  { %188 = vmatpush.bf16.msra.mxu0 %v407_v5  ;;  %436 = vmatpush.bf16.msra.mxu1 %v407_v5 }
  0x17   :  { %437 = vmatpush.bf16.msra.mxu2 %v407_v5  ;;  %438 = vmatpush.bf16.msra.mxu3 %v407_v5 }
  0x1a   :  { %189 = vmatpush.bf16.msra.mxu0 %v406_v6  ;;  %439 = vmatpush.bf16.msra.mxu1 %v406_v6 }
  0x1b   :  { %440 = vmatpush.bf16.msra.mxu2 %v406_v6  ;;  %441 = vmatpush.bf16.msra.mxu3 %v406_v6 }
  0x1e   :  { %190 = vmatpush.bf16.msra.mxu0 %v405_v7  ;;  %442 = vmatpush.bf16.msra.mxu1 %v405_v7 }
  0x1f   :  { %443 = vmatpush.bf16.msra.mxu2 %v405_v7  ;;  %444 = vmatpush.bf16.msra.mxu3 %v405_v7 }
  0x21   :  { %191 = vmatmul.bf16.vlgmr.msra.gmra.mxu0 %v413_v8  ;;  %201 = vmatmul.bf16.vlgmr.msra.gmra.mxu1 %v415_v9 }
  0x22   :  { %211 = vmatmul.bf16.vlgmr.msra.gmra.mxu2 %v417_v10  ;;  %221 = vmatmul.bf16.vlgmr.msra.gmra.mxu3 %v419_v11 }
  0x31   :  { %196 = vmatmul.bf16.gmra.mxu0 %v414_v12  ;;  %206 = vmatmul.bf16.gmra.mxu1 %v416_v13 }
  0x32   :  { %216 = vmatmul.bf16.gmra.mxu2 %v418_v14  ;;  %226 = vmatmul.bf16.gmra.mxu3 %v420_v15 }
  0x9e   :  { %v192_v17 = vpop.f32.mrf.mxu0  ;;  %v202_v18 = vpop.f32.mrf.mxu1 }
  0x9f   :  { %v287_v19 = vadd.f32 %v445_v16, %v192_v17  ;;  %v291_v20 = vadd.f32 %v445_v16, %v202_v18 }
  0xa1   :  { %v303_v21 = vmax.f32 %v287_v19, 0.0  ;;  %v307_v22 = vmax.f32 %v291_v20, 0.0 }
  0xa3   :  { %319 = vst [vmem:[%s568_s3] sm:$0xff] %v303_v21 }
  0xa4   :  { %323 = vst [vmem:[%s568_s3 + $0x20] sm:$0xff] %v307_v22 }
  0xa5   :  { %v212_v23 = vpop.f32.mrf.mxu2  ;;  %v222_v24 = vpop.f32.mrf.mxu3 }
  0xa6   :  { %v295_v25 = vadd.f32 %v445_v16, %v212_v23  ;;  %v299_v26 = vadd.f32 %v445_v16, %v222_v24  ;;  %v194_v27 = vpop.f32.mrf.mxu0  ;;  %v204_v28 = vpop.f32.mrf.mxu1 }
  0xa7   :  { %v288_v29 = vadd.f32 %v445_v16, %v194_v27  ;;  %v292_v30 = vadd.f32 %v445_v16, %v204_v28 }
  0xa8   :  { %v311_v31 = vmax.f32 %v295_v25, 0.0  ;;  %v315_v32 = vmax.f32 %v299_v26, 0.0 }
  0xa9   :  { %v304_v33 = vmax.f32 %v288_v29, 0.0  ;;  %v308_v34 = vmax.f32 %v292_v30, 0.0 }
  0xaa   :  { %327 = vst [vmem:[%s568_s3 + $0x40] sm:$0xff] %v311_v31 }
  0xab   :  { %331 = vst [vmem:[%s568_s3 + $0x60] sm:$0xff] %v315_v32 }
  0xac   :  { %320 = vst [vmem:[%s568_s3 + $0x8] sm:$0xff] %v304_v33 }
  0xad   :  { %324 = vst [vmem:[%s568_s3 + $0x28] sm:$0xff] %v308_v34  ;;  %v214_v35 = vpop.f32.mrf.mxu2  ;;  %v224_v36 = vpop.f32.mrf.mxu3 }
  0xae   :  { %v296_v37 = vadd.f32 %v445_v16, %v214_v35  ;;  %v300_v38 = vadd.f32 %v445_v16, %v224_v36  ;;  %v197_v39 = vpop.f32.mrf.mxu0  ;;  %v207_v40 = vpop.f32.mrf.mxu1 }
  0xaf   :  { %v289_v41 = vadd.f32 %v445_v16, %v197_v39  ;;  %v293_v42 = vadd.f32 %v445_v16, %v207_v40 }
  0xb0   :  { %v312_v43 = vmax.f32 %v296_v37, 0.0  ;;  %v316_v44 = vmax.f32 %v300_v38, 0.0 }
  0xb1   :  { %v305_v45 = vmax.f32 %v289_v41, 0.0  ;;  %v309_v46 = vmax.f32 %v293_v42, 0.0 }
  0xb2   :  { %328 = vst [vmem:[%s568_s3 + $0x48] sm:$0xff] %v312_v43 }
  0xb3   :  { %332 = vst [vmem:[%s568_s3 + $0x68] sm:$0xff] %v316_v44 }
  0xb4   :  { %321 = vst [vmem:[%s568_s3 + $0x10] sm:$0xff] %v305_v45 }
  0xb5   :  { %325 = vst [vmem:[%s568_s3 + $0x30] sm:$0xff] %v309_v46  ;;  %v217_v47 = vpop.f32.mrf.mxu2  ;;  %v227_v48 = vpop.f32.mrf.mxu3 }
  0xb6   :  { %v297_v49 = vadd.f32 %v445_v16, %v217_v47  ;;  %v301_v50 = vadd.f32 %v445_v16, %v227_v48  ;;  %v199_v51 = vpop.f32.mrf.mxu0  ;;  %v209_v52 = vpop.f32.mrf.mxu1 }
  0xb7   :  { %v290_v53 = vadd.f32 %v445_v16, %v199_v51  ;;  %v294_v54 = vadd.f32 %v445_v16, %v209_v52 }
  0xb8   :  { %v313_v55 = vmax.f32 %v297_v49, 0.0  ;;  %v317_v56 = vmax.f32 %v301_v50, 0.0 }
  0xb9   :  { %v306_v57 = vmax.f32 %v290_v53, 0.0  ;;  %v310_v58 = vmax.f32 %v294_v54, 0.0 }
  0xba   :  { %329 = vst [vmem:[%s568_s3 + $0x50] sm:$0xff] %v313_v55 }
  0xbb   :  { %333 = vst [vmem:[%s568_s3 + $0x70] sm:$0xff] %v317_v56 }
  0xbc   :  { %322 = vst [vmem:[%s568_s3 + $0x18] sm:$0xff] %v306_v57 }
  0xbd   :  { %326 = vst [vmem:[%s568_s3 + $0x38] sm:$0xff] %v310_v58  ;;  %v219_v59 = vpop.f32.mrf.mxu2  ;;  %v229_v60 = vpop.f32.mrf.mxu3 }
  0xbe   :  { %v298_v61 = vadd.f32 %v445_v16, %v219_v59  ;;  %v302_v62 = vadd.f32 %v445_v16, %v229_v60 }
  0xc0   :  { %v314_v63 = vmax.f32 %v298_v61, 0.0  ;;  %v318_v0 = vmax.f32 %v302_v62, 0.0 }
  0xc2   :  { %330 = vst [vmem:[%s568_s3 + $0x58] sm:$0xff] %v314_v63 }
  0xc3   :  { %334 = vst [vmem:[%s568_s3 + $0x78] sm:$0xff] %v318_v0 }

</bundles_post_ra>
